<compile_context>
chip_gen: v7x
topology: tpu7x:2x2x1
jax: 0.10.0
libtpu: 0.0.40
codegen_flags: <defaults>
</compile_context>

<pallas_src>
import functools

import jax
import jax.numpy as jnp
from jax.experimental import pallas as pl
from jax.experimental.pallas import tpu as pltpu


NEG_BIG = -1e30  # safe "-inf" sentinel: exp underflows to exactly 0 under the row max


# --------------------------------------------------------------------------
# Prologue: L2-normalize once, fold 1/temperature into the query copy, cast
# both operands to bf16 for the MXU.
# --------------------------------------------------------------------------
def _normalize_kernel(x_ref, q_ref, k_ref, *, inv_temp):
    x = x_ref[...].astype(jnp.float32)                                # (T, D)
    # F.normalize(dim=1): x / max(||x||, 1e-12)  (eps on the sum of squares)
    inv_n = jax.lax.rsqrt(
        jnp.maximum(jnp.sum(x * x, axis=1, keepdims=True), 1e-24))
    xn = x * inv_n
    k_ref[...] = xn.astype(k_ref.dtype)                               # keys
    q_ref[...] = (xn * inv_temp).astype(q_ref.dtype)                  # queries


# --------------------------------------------------------------------------
# Main kernel: flash-style online logsumexp over the (N, N) similarity matrix.
# --------------------------------------------------------------------------
def _ntxent_kernel(q_ref, k_ref, out_ref, m_sc, l_sc, pos_sc, *,
                   partner_offset, num_row_blocks, resident):
    i = pl.program_id(0)          # row-tile index    ("parallel")
    j = pl.program_id(1)          # column-tile index ("arbitrary", innermost)
    tile = q_ref.shape[0]

    # ---- per-row-tile init (first column step) -----------------------------
    @pl.when(j == 0)
    def _():
        m_sc[...] = jnp.full_like(m_sc, NEG_BIG)
        l_sc[...] = jnp.zeros_like(l_sc)
        pos_sc[...] = jnp.zeros_like(pos_sc)

    q = q_ref[...]                                                    # (T, D) bf16, pre-normalized * 1/temp
    if resident:
        # Full normalized key matrix is resident in VMEM; slice a column tile.
        col = pl.multiple_of(j * tile, tile)
        kn = k_ref[pl.ds(col, tile), :]                               # (T, D) bf16
    else:
        kn = k_ref[...]                                               # (T, D) bf16

    # ---- similarity tile: bf16 MXU, f32 accumulation, no transpose ---------
    s = jax.lax.dot_general(
        q, kn,
        dimension_numbers=(((1,), (1,)), ((), ())),
        preferred_element_type=jnp.float32)                           # (T, T) f32

    # ---- positive logit: local diagonal of the partner column tile ---------
    # global row (i*T + r) pairs with column ((i*T + r + B) % N), which lives
    # in column tile (i + B//T) % nrb at local column r.
    @pl.when(j == (i + partner_offset) % num_row_blocks)
    def _():
        lr = jax.lax.broadcasted_iota(jnp.int32, s.shape, 0)
        lc = jax.lax.broadcasted_iota(jnp.int32, s.shape, 1)
        pos_sc[...] = jnp.sum(jnp.where(lr == lc, s, 0.0),
                              axis=1, keepdims=True)

    # ---- mask self-similarity; only the i == j tile touches the diagonal ---
    def _mask_diag(t):
        lr = jax.lax.broadcasted_iota(jnp.int32, t.shape, 0)
        lc = jax.lax.broadcasted_iota(jnp.int32, t.shape, 1)
        return jnp.where(lr == lc, NEG_BIG, t)

    s = jax.lax.cond(i == j, _mask_diag, lambda t: t, s)

    # ---- online logsumexp over all off-diagonal logits (f32, v5e-safe) -----
    m_prev = m_sc[...]
    m_new = jnp.maximum(m_prev, jnp.max(s, axis=1, keepdims=True))
    l_sc[...] = (l_sc[...] * jnp.exp(m_prev - m_new)
                 + jnp.sum(jnp.exp(s - m_new), axis=1, keepdims=True))
    m_sc[...] = m_new

    # ---- finalize per-row loss at the last column step ----------------------
    @pl.when(j == pl.num_programs(1) - 1)
    def _():
        out_ref[...] = m_sc[...] + jnp.log(l_sc[...]) - pos_sc[...]   # (T, 1)


def _pick_tile(batch_size):
    # Largest tile <= 256 that divides batch_size.  256 fills the v6e/v7x MXU
    # (128 already fills v5e); tile <= batch_size guarantees >= 2 row tiles,
    # so the "parallel" row axis always keeps both v7x TensorCores busy.
    for t in (256, 128, 64, 32, 16, 8):
        if batch_size % t == 0:
            return t
    raise ValueError(
        f"batch_size must be a multiple of 8 for the tiled NT-Xent kernel "
        f"(got {batch_size})")


def _vmem_limit_bytes():
    # Generation-aware scoped-VMEM limit: ~48 MiB on v7x (64 MiB physical),
    # ~96 MiB on v5e/v6e (128 MiB physical); conservative fallback otherwise.
    try:
        cap = int(pltpu.get_tpu_info().vmem_capacity_bytes)
    except Exception:
        cap = 64 * 1024 * 1024
    return min(int(cap * 0.75), 100 * 1024 * 1024)


def ntxent_loss(features, *, batch_size, temperature, tile=None,
                force_streaming=False):
    n, d = features.shape
    assert n == 2 * batch_size, "features must stack 2 views of the batch"
    if tile is None:
        tile = _pick_tile(batch_size)
    assert batch_size % tile == 0 and tile % 8 == 0

    nrb = n // tile                     # number of row tiles == column tiles
    inv_temp = 1.0 / float(temperature)

    vmem_limit = _vmem_limit_bytes()
    key_bytes = n * d * 2               # normalized keys, bf16
    # Resident keys only if the (double-buffered) key block uses at most half
    # of the scoped VMEM limit -> safe on v7x, generous on v5e/v6e.
    resident = (not force_streaming) and (2 * key_bytes <= vmem_limit // 2)

    # ---- prologue: normalize once, fold 1/temperature, cast bf16 -----------
    q_bf, k_bf = pl.pallas_call(
        functools.partial(_normalize_kernel, inv_temp=inv_temp),
        out_shape=(jax.ShapeDtypeStruct((n, d), jnp.bfloat16),
                   jax.ShapeDtypeStruct((n, d), jnp.bfloat16)),
        grid=(nrb,),
        in_specs=[pl.BlockSpec((tile, d), lambda i: (i, 0))],
        out_specs=(pl.BlockSpec((tile, d), lambda i: (i, 0)),
                   pl.BlockSpec((tile, d), lambda i: (i, 0))),
        compiler_params=pltpu.CompilerParams(
            dimension_semantics=("parallel",)),
    )(features)

    # ---- main kernel: choose resident-K vs streaming key pipeline ----------
    if resident:
        # Full (N, D) key block, constant index_map -> DMA'd once, stays
        # resident in VMEM; the kernel slices column tiles with pl.ds.
        k_spec = pl.BlockSpec((n, d), lambda i, j: (0, 0))
        key_traffic = key_bytes
    else:
        # Streaming key tiles with a 3-deep pipeline to hide the per-step DMA
        # behind the (now short) bf16 matmul.
        k_spec = pl.BlockSpec((tile, d), lambda i, j: (j, 0),
                              pipeline_mode=pl.Buffered(3))
        key_traffic = nrb * key_bytes

    kernel = functools.partial(
        _ntxent_kernel,
        partner_offset=batch_size // tile,
        num_row_blocks=nrb,
        resident=resident,
    )

    per_row = pl.pallas_call(
        kernel,
        out_shape=jax.ShapeDtypeStruct((n, 1), jnp.float32),
        grid_spec=pltpu.PrefetchScalarGridSpec(
            num_scalar_prefetch=0,
            grid=(nrb, nrb),
            in_specs=[
                pl.BlockSpec((tile, d), lambda i, j: (i, 0)),  # query rows
                k_spec,                                        # key rows
            ],
            out_specs=pl.BlockSpec((tile, 1), lambda i, j: (i, 0)),
            scratch_shapes=[
                pltpu.VMEM((tile, 1), jnp.float32),   # running max
                pltpu.VMEM((tile, 1), jnp.float32),   # running sum of exp
                pltpu.VMEM((tile, 1), jnp.float32),   # positive logit
            ],
        ),
        compiler_params=pltpu.CompilerParams(
            dimension_semantics=("parallel", "arbitrary"),
            vmem_limit_bytes=vmem_limit,
        ),
        cost_estimate=pl.CostEstimate(
            flops=2 * n * n * d,
            transcendentals=n * n,
            bytes_accessed=key_traffic + key_bytes + n * 4,
        ),
    )(q_bf, k_bf)

    # Tiny O(N) epilogue (mean reduction) stays in plain JAX.
    return jnp.mean(per_row)


def _ntxent_reference(features, *, batch_size, temperature):
    """Plain-JAX f32 reference mirroring the PyTorch forward exactly."""
    n = features.shape[0]
    x = features.astype(jnp.float32)
    xn = x / jnp.maximum(jnp.linalg.norm(x, axis=1, keepdims=True), 1e-12)
    sim = xn @ xn.T
    ids = jnp.arange(n)
    same = (ids[None, :] % batch_size) == (ids[:, None] % batch_size)
    diag = ids[None, :] == ids[:, None]
    logits = sim / temperature
    pos = jnp.sum(jnp.where(same & ~diag, logits, 0.0), axis=1)
    masked = jnp.where(diag, -jnp.inf, logits)
    lse = jax.scipy.special.logsumexp(masked, axis=1)
    return jnp.mean(lse - pos)


if __name__ == "__main__":
    batch_size = 128          # args.batchSz
    temperature = 0.5         # args.temperature
    feat_dim = 128            # lane-aligned feature dim
    n = 2 * batch_size        # nViews = 2

    key = jax.random.PRNGKey(0)
    k1, k2 = jax.random.split(key)
    # Correlated views so the positive logit is clearly non-trivial.
    view1 = jax.random.normal(k1, (batch_size, feat_dim), dtype=jnp.float32)
    view2 = view1 + 0.1 * jax.random.normal(k2, (batch_size, feat_dim),
                                            dtype=jnp.float32)
    features = jnp.concatenate([view1, view2], axis=0)

    ref = _ntxent_reference(features, batch_size=batch_size,
                            temperature=temperature)

    # Resident-key fast path (keys fit VMEM at this size).
    loss = jax.block_until_ready(
        ntxent_loss(features, batch_size=batch_size, temperature=temperature))
    assert jnp.allclose(loss, ref, atol=1e-2, rtol=1e-2), ("resident", loss, ref)

    # Streaming fallback path (forced), to exercise the 2-D pipelined variant.
    loss_s = jax.block_until_ready(
        ntxent_loss(features, batch_size=batch_size, temperature=temperature,
                    force_streaming=True))
    assert jnp.allclose(loss_s, ref, atol=1e-2, rtol=1e-2), ("streaming", loss_s, ref)

    print("KERNEL_OK")
</pallas_src>

<mosaic_0001>
module attributes {stable_mosaic.version = 11 : i64} {
  func.func @_normalize_kernel(%arg0: i32, %arg1: memref<128x128xf32, #tpu.memory_space<vmem>>, %arg2: memref<128x128xbf16, #tpu.memory_space<vmem>>, %arg3: memref<128x128xbf16, #tpu.memory_space<vmem>>) attributes {dimension_semantics = [#tpu.dimension_semantics<parallel>], iteration_bounds = array<i64: 2>, scalar_prefetch = 0 : i64, scratch_operands = 0 : i64, tpu.core_type = #tpu.core_type<tc>, window_params = [{transform_indices = @transform_0, window_bounds = array<i64: 128, 128>}, {transform_indices = @transform_1, window_bounds = array<i64: 128, 128>}, {transform_indices = @transform_2, window_bounds = array<i64: 128, 128>}]} {
    %c0 = arith.constant 0 : index
    %c0_0 = arith.constant 0 : index
    %0 = vector.load %arg1[%c0, %c0_0] : memref<128x128xf32, #tpu.memory_space<vmem>>, vector<128x128xf32>
    %1 = arith.mulf %0, %0 : vector<128x128xf32>
    %cst = arith.constant dense<0.000000e+00> : vector<128xf32>
    %2 = vector.multi_reduction <add>, %1, %cst [1] : vector<128x128xf32> to vector<128xf32>
    %3 = vector.shape_cast %2 : vector<128xf32> to vector<128x1xf32>
    %cst_1 = arith.constant 1.000000e-24 : f32
    %4 = vector.broadcast %cst_1 : f32 to vector<128x1xf32>
    %5 = arith.maximumf %3, %4 : vector<128x1xf32>
    %6 = math.rsqrt %5 : vector<128x1xf32>
    %7 = vector.broadcast %6 : vector<128x1xf32> to vector<128x128xf32>
    %8 = arith.mulf %0, %7 : vector<128x128xf32>
    %9 = arith.truncf %8 : vector<128x128xf32> to vector<128x128xbf16>
    %c0_2 = arith.constant 0 : index
    %c0_3 = arith.constant 0 : index
    %10 = vector.load %arg3[%c0_2, %c0_3] : memref<128x128xbf16, #tpu.memory_space<vmem>>, vector<128x128xbf16>
    tpu.vector_store %arg3[%c0_2, %c0_3], %9 {strides = array<i32>} : memref<128x128xbf16, #tpu.memory_space<vmem>>, vector<128x128xbf16>,
    %cst_4 = arith.constant 2.000000e+00 : f32
    %11 = vector.broadcast %cst_4 : f32 to vector<128x128xf32>
    %12 = arith.mulf %8, %11 : vector<128x128xf32>
    %13 = arith.truncf %12 : vector<128x128xf32> to vector<128x128xbf16>
    %c0_5 = arith.constant 0 : index
    %c0_6 = arith.constant 0 : index
    %14 = vector.load %arg2[%c0_5, %c0_6] : memref<128x128xbf16, #tpu.memory_space<vmem>>, vector<128x128xbf16>
    tpu.vector_store %arg2[%c0_5, %c0_6], %13 {strides = array<i32>} : memref<128x128xbf16, #tpu.memory_space<vmem>>, vector<128x128xbf16>,
    return
  }
  func.func @transform_0(%arg0: i32) -> (i32, i32) {
    %c0_i32 = arith.constant 0 : i32
    %c0_i32_0 = arith.constant 0 : i32
    return %arg0, %c0_i32 : i32, i32
  }
  func.func @transform_1(%arg0: i32) -> (i32, i32) {
    %c0_i32 = arith.constant 0 : i32
    %c0_i32_0 = arith.constant 0 : i32
    return %arg0, %c0_i32 : i32, i32
  }
  func.func @transform_2(%arg0: i32) -> (i32, i32) {
    %c0_i32 = arith.constant 0 : i32
    %c0_i32_0 = arith.constant 0 : i32
    return %arg0, %c0_i32 : i32, i32
  }
}

</mosaic_0001>

<bundles_post_ra>
// kernel: tpu_custom_call.1
= control target key start
LH: loop header
LB: loop body
LE: loop exit
PB: predicated region body
PF: predicated region fallthrough
CT: control target
= control target key end

     0   :  { %8 = vsyncpa [#allocation3], 0  ;;  %s1346_s0 = inlined_call_operand.hbm [shape: f32[256,128], index: 0, kind: input, shape index: {}]   ;;  %s1347_s1 = inlined_call_operand.hbm [shape: bf16[256,128], index: 1, kind: output, shape index: {0}]   ;;  %s1348_s2 = inlined_call_operand.hbm [shape: bf16[256,128], index: 2, kind: output, shape index: {1}]  }
   0x1   :  { %10 = vsyncpa [#allocation3 + $0x1], 0 }
   0x2   :  { %11 = vsyncpa [#allocation4], 0 }
   0x3   :  { %13 = vsyncpa [#allocation4 + $0x1], 0 }
   0x4   :  { %14 = vsyncpa [#allocation7], 0 }
   0x5   :  { %16 = vsyncpa [#allocation7 + $0x1], 0  ;;  %s1022_s9 = smov 0   ;;  %s1024_s10 = smov 0  }
   0x6   :  { %s1026_s11 = smov 0   ;;  %s1028_s12 = smov 0  }
   0x7 LB: > { %s1043_s13 = sadd.s32 4294967295, %s998_s12   ;;  %s604_s14 = sadd.s32 4294967294, %s998_s12   ;;  %s998_s12 = sphi %s1028_s12, %s1361_s12   ;;  %s994_s11 = sphi %s1026_s11, %s1360_s11   ;;  %s990_s10 = sphi %s1024_s10, %s1359_s10   ;;  %s986_s9 = sphi %s1022_s9, %s1358_s9  }
   0x8   : > { %s1047_s15 = sadd.s32 1, %s998_s12   ;;  %s29_s16 = sadd.s32 1, %s994_s11 }
   0x9   : > { %s26_s17 = ssub.s32 %s998_s12, %s1047_s15  ;;  %p36_p0 = scmp.ne.s32.totalorder %s994_s11, %s990_s10 }
   0xa   : > { %p27_p1 = scmp.eq.s32.totalorder %s26_s17, 0  ;;  %p37_p2 = scmp.eq.s32.totalorder %s998_s12, 0 }
   0xb   : > { %p42_p3 = scmp.ne.s32.totalorder %s990_s10, %s986_s9  ;;  %p43_p4 = scmp.eq.s32.totalorder %s1043_s13, 0 }
   0xc   : > { %s1059_s18 = scalar_select %p27_p1, %s994_s11, %s29_s16  }
   0xd   : > { %p1061_p5 = por %p37_p2, %p36_p0  ;;  %p1065_p6 = por %p43_p4, %p42_p3 }
   0xe   : > { %p66_p7 = scmp.eq.s32.totalorder %s1043_s13, 1  ;;  %p72_p8 = scmp.eq.s32.totalorder %s604_s14, 1 }
   0xf   : > { %p800_p10 = scmp.lt.s32.totalorder %s998_s12, 2  ;;  %s118_s23 = sand.u32 1, %s994_s11  }
  0x10   : > { %p1072_p11 = por %p66_p7, %p36_p0  ;;  %p1076_p12 = por %p72_p8, %p42_p3 }
  0x11   : > { %s654_s24 = sshll.u32 %s998_s12, 11  ;;  %s607_s25 = sshll.u32 %s118_s23, 7 }
  0x12   : > { %s1352_s21 = scalar_select %p1072_p11, 1, 0 }
  0x13   : > { %s1353_s22 = scalar_select %p1076_p12, 1, 0 }
  0x14   : > { %s1085_s28 = scalar_lea.hbm %s1346_s0, %s654_s24  ;;  %s122_s29 = scalar_lea.vmem [#allocation2], %s607_s25 }
  0x15   : > { %s129_s30 = sshll.u32 %s122_s29, 4  ;;  %p1089_p13 = pnand %p800_p10, %p1061_p5  ;;  %s1093_s30 = int_to_ptr.vmem [resolvable:$true] %s129_s30 }
  0x16   : > { %s1095_s4 = scalar_lea.sflag [#allocation3], %s118_s23  ;;  %s870_s5 = scalar_lea.hbm %s1085_s28, 2048 }
  0x17   : > { %p871_p0 = scmp.ne.s32.totalorder %s1085_s28, %s870_s5  ;;  %p872_p1 = pneg %p1089_p13 }
  0x18   : > { %s875_s8 = scalar_lea.hbm %s1346_s0, 4096  ;;  %p876_p4 = scmp.lt.u32.totalorder %s1085_s28, %s1346_s0 }
  0x19   : > { %p873_p2 = pnand %p872_p1, %p871_p0  ;;  %p877_p5 = scmp.lt.u32.totalorder %s875_s8, %s870_s5 }
  0x1a   : > { %p879_p8 = scmp.lt.u32.totalorder %s870_s5, %s1085_s28 }
  0x1b   : > { %p874_p3 = pneg %p873_p2  ;;  %p878_p7 = por %p877_p5, %p876_p4 }
  0x1d   : > { %p880_p10 = por %p879_p8, %p878_p7 }
  0x1f   : > { %p881_p9 = pnand %p880_p10, %p874_p3 }
  0x21   : > { %884 = shalt.err (!%p881_p9)
}
  0x22   : > { %s885_s17 = scalar_lea.vmem %s1093_s30, 2048  ;;  %s1000_s19 = smov [#allocation2]  }
  0x23   : > { %p886_p0 = scmp.ne.s32.totalorder %s1093_s30, %s885_s17  ;;  %s890_s23 = sshll.u32 %s1000_s19, 4  ;;  %s891_s23 = int_to_ptr.vmem [resolvable:$false] %s890_s23 }
  0x24   : > { %s892_s24 = scalar_lea.vmem %s891_s23, 4096  ;;  %p893_p11 = scmp.lt.s32.totalorder %s1093_s30, %s891_s23 }
  0x25   : > { %p888_p2 = pnand %p886_p0, %p872_p1  ;;  %p894_p4 = scmp.lt.s32.totalorder %s892_s24, %s885_s17 }
  0x27   : > { %p889_p12 = pneg %p888_p2  ;;  %p895_p5 = por %p894_p4, %p893_p11 }
  0x29   : > { %p896_p7 = pnand %p895_p5, %p889_p12 }
  0x2b   : > { %899 = shalt.err (!%p896_p7)
}
  0x2c   : > { %s1001_s25 = smov 128   ;;  %s1002_s26 = smov 8  }
  0x2d   : > { %792 = dma.hbm_to_vmem [thread:$0]  (!%p1089_p13), %s1085_s28, 2048, %s1093_s30, %s1095_s4, %s1001_s25, %s1001_s25, %s1002_s26  }
  0x2e   : > { %p610_p9 = scmp.ge.s32.totalorder %s998_s12, 1  ;;  %p137_p1 = scmp.lt.s32.totalorder %s998_s12, 3 }
  0x30   : > { %p138_p3 = pnand %p610_p9, %p137_p1 }
  0x31   : > { %s1126_s27 = sand.u32 (!%p138_p3), 1, %s990_s10  }
  0x32   : > { %141 = sbr.rel (%p138_p3) target bundleno = 287 (0x11f), region = 24  ;;  %s611_s29 = sshll.u32 (!%p138_p3), %s1126_s27, 7 }
  0x33   : > { %s144_s5 = scalar_lea.sflag (!%p138_p3), [#allocation3], %s1126_s27  ;;  %s1130_s6 = scalar_lea.vmem (!%p138_p3), [#allocation2], %s611_s29 }
  0x39   : > { %973 = dma.done.wait (%p1065_p6), %s144_s5, 2048  }
  0x3a   : > { %975 = vsyncadd (%p1065_p6), %s144_s5, 4294965248  ;;  %v1137_v0 = vld [vmem:[%s1130_s6 + $0x10] sm:$0xff]  ;;  %v1140_v1 = vld [vmem:[%s1130_s6] sm:$0xff]  ;;  %s612_s20 = sshll.u32 %s1126_s27, 6  ;;  %s687_s3 = sshll.u32 %s1043_s13, 10 }
  0x3b   : > { %v1143_v2 = vld [vmem:[%s1130_s6 + $0x18] sm:$0xff]  ;;  %v194_v3 = vmul.f32 %v1137_v0, %v1137_v0  ;;  %v192_v4 = vmul.f32 %v1140_v1, %v1140_v1  ;;  %v1150_v5 = vld [vmem:[%s1130_s6 + $0x8] sm:$0xff]  ;;  %v1160_v9 = vld [vmem:[%s1130_s6 + $0x20] sm:$0xff]  ;;  %s1223_s28 = scalar_lea.vmem [#allocation6], %s612_s20  ;;  %s1231_s30 = scalar_lea.vmem [#allocation5], %s612_s20 }
  0x3c   : > { %v195_v6 = vmul.f32 %v1143_v2, %v1143_v2  ;;  %v193_v7 = vmul.f32 %v1150_v5, %v1150_v5  ;;  %v1157_v8 = vld [vmem:[%s1130_s6 + $0x28] sm:$0xff]  ;;  %v196_v11 = vmul.f32 %v1160_v9, %v1160_v9  ;;  %v1167_v12 = vld [vmem:[%s1130_s6 + $0x38] sm:$0xff]  ;;  %v1170_v13 = vld [vmem:[%s1130_s6 + $0x30] sm:$0xff]  ;;  %s499_s4 = sshll.u32 %s1223_s28, 4  ;;  %s483_s7 = sshll.u32 %s1231_s30, 4  ;;  %s1263_s4 = int_to_ptr.vmem [resolvable:$true] %s499_s4  ;;  %s1271_s7 = int_to_ptr.vmem [resolvable:$true] %s483_s7 }
  0x3d   : > { %212 = vadd.xlane.f32.xlu1 %v194_v3  ;;  %208 = vadd.xlane.f32.xlu0 %v192_v4  ;;  %v197_v10 = vmul.f32 %v1157_v8, %v1157_v8  ;;  %v199_v14 = vmul.f32 %v1167_v12, %v1167_v12  ;;  %v198_v15 = vmul.f32 %v1170_v13, %v1170_v13  ;;  %v1177_v16 = vld [vmem:[%s1130_s6 + $0x48] sm:$0xff]  ;;  %v1180_v17 = vld [vmem:[%s1130_s6 + $0x40] sm:$0xff]  ;;  %v1187_v20 = vld [vmem:[%s1130_s6 + $0x58] sm:$0xff]  ;;  %s1261_s16 = scalar_lea.hbm %s1348_s2, %s687_s3  ;;  %s1269_s19 = scalar_lea.hbm %s1347_s1, %s687_s3 }
  0x3e   : > { %v201_v18 = vmul.f32 %v1177_v16, %v1177_v16  ;;  %v200_v19 = vmul.f32 %v1180_v17, %v1180_v17  ;;  %v1190_v21 = vld [vmem:[%s1130_s6 + $0x50] sm:$0xff]  ;;  %v203_v22 = vmul.f32 %v1187_v20, %v1187_v20  ;;  %v1197_v24 = vld [vmem:[%s1130_s6 + $0x68] sm:$0xff]  ;;  %v1200_v25 = vld [vmem:[%s1130_s6 + $0x60] sm:$0xff]  ;;  %s470_s23 = scalar_lea.sflag [#allocation7], %s1126_s27  ;;  %s900_s24 = scalar_lea.vmem %s1263_s4, 1024 }
  0x3f   : > { %v202_v23 = vmul.f32 %v1190_v21, %v1190_v21  ;;  %v205_v26 = vmul.f32 %v1197_v24, %v1197_v24  ;;  %v204_v27 = vmul.f32 %v1200_v25, %v1200_v25  ;;  %v1207_v28 = vld [vmem:[%s1130_s6 + $0x78] sm:$0xff]  ;;  %v1210_v29 = vld [vmem:[%s1130_s6 + $0x70] sm:$0xff]  ;;  %p901_p6 = scmp.ne.s32.totalorder %s1263_s4, %s900_s24  ;;  %p1355_p11 = scmp.ne.s32.totalorder %s1352_s21, 0 }
  0x40   : > { %v207_v30 = vmul.f32 %v1207_v28, %v1207_v28  ;;  %v206_v31 = vmul.f32 %v1210_v29, %v1210_v29  ;;  %s1003_s25 = smov [#allocation6]  }
  0x41   : > { %214 = vadd.xlane.f32.xlu1 %v195_v6  ;;  %210 = vadd.xlane.f32.xlu0 %v193_v7  ;;  %p902_p12 = pnand %p901_p6, %p1355_p11  ;;  %s904_s26 = sshll.u32 %s1003_s25, 4  ;;  %s905_s26 = int_to_ptr.vmem [resolvable:$false] %s904_s26 }
  0x42   : > { %s906_s29 = scalar_lea.vmem %s905_s26, 2048  ;;  %p907_p8 = scmp.lt.s32.totalorder %s1263_s4, %s905_s26 }
  0x43   : > { %p903_p13 = pneg %p902_p12  ;;  %p908_p10 = scmp.lt.s32.totalorder %s906_s29, %s900_s24 }
  0x45   : > { %218 = vadd.xlane.f32.xlu1 %v197_v10  ;;  %216 = vadd.xlane.f32.xlu0 %v196_v11  ;;  %p909_p0 = por %p908_p10, %p907_p8 }
  0x47   : > { %p910_p2 = pnand %p909_p0, %p903_p13 }
  0x49   : > { %222 = vadd.xlane.f32.xlu1 %v199_v14  ;;  %220 = vadd.xlane.f32.xlu0 %v198_v15 }
  0x4d   : > { %226 = vadd.xlane.f32.xlu1 %v201_v18  ;;  %224 = vadd.xlane.f32.xlu0 %v200_v19 }
  0x51   : > { %230 = vadd.xlane.f32.xlu1 %v203_v22  ;;  %228 = vadd.xlane.f32.xlu0 %v202_v23 }
  0x55   : > { %234 = vadd.xlane.f32.xlu1 %v205_v26  ;;  %232 = vadd.xlane.f32.xlu0 %v204_v27 }
  0x59   : > { %238 = vadd.xlane.f32.xlu1 %v207_v30  ;;  %236 = vadd.xlane.f32.xlu0 %v206_v31 }
  0xca   : > { %v213_v32 = vpop.xlane.xlu1 %212  ;;  %v209_v33 = vpop.xlane.xlu0 %208 }
  0xcb   : > { %v242_v34 = vmax.f32 %v213_v32, 1e-24  ;;  %v240_v35 = vmax.f32 %v209_v33, 1e-24 }
  0xcd   : > { %838 = vrsqrt.f32 %v242_v34 }
  0xce   : > { %840 = vrsqrt.f32 %v240_v35  ;;  %v215_v36 = vpop.xlane.xlu1 %214  ;;  %v211_v37 = vpop.xlane.xlu0 %210 }
  0xcf   : > { %v243_v38 = vmax.f32 %v215_v36, 1e-24  ;;  %v241_v39 = vmax.f32 %v211_v37, 1e-24 }
  0xd1   : > { %842 = vrsqrt.f32 %v243_v38 }
  0xd2   : > { %844 = vrsqrt.f32 %v241_v39  ;;  %v219_v40 = vpop.xlane.xlu1 %218  ;;  %v217_v41 = vpop.xlane.xlu0 %216 }
  0xd3   : > { %v245_v42 = vmax.f32 %v219_v40, 1e-24  ;;  %v244_v43 = vmax.f32 %v217_v41, 1e-24 }
  0xd5   : > { %846 = vrsqrt.f32 %v245_v42 }
  0xd6   : > { %848 = vrsqrt.f32 %v244_v43  ;;  %v223_v44 = vpop.xlane.xlu1 %222  ;;  %v221_v45 = vpop.xlane.xlu0 %220 }
  0xd7   : > { %v839_v46 = vpop.eup %838  ;;  %v247_v47 = vmax.f32 %v223_v44, 1e-24  ;;  %v246_v48 = vmax.f32 %v221_v45, 1e-24 }
  0xd8   : > { %v841_v49 = vpop.eup %840  ;;  %v274_v50 = vmul.f32 %v839_v46, %v1137_v0 }
  0xd9   : > { %850 = vrsqrt.f32 %v247_v47  ;;  %v272_v51 = vmul.f32 %v841_v49, %v1140_v1 }
  0xda   : > { %852 = vrsqrt.f32 %v246_v48  ;;  %v227_v52 = vpop.xlane.xlu1 %226  ;;  %v225_v53 = vpop.xlane.xlu0 %224  ;;  %v370_v59 = vmul.f32 2.0, %v274_v50 }
  0xdb   : > { %v843_v54 = vpop.eup %842  ;;  %v249_v55 = vmax.f32 %v227_v52, 1e-24  ;;  %v248_v56 = vmax.f32 %v225_v53, 1e-24  ;;  %v368_v61 = vmul.f32 2.0, %v272_v51 }
  0xdc   : > { %v845_v57 = vpop.eup %844  ;;  %v275_v58 = vmul.f32 %v843_v54, %v1143_v2 }
  0xdd   : > { %v273_v60 = vmul.f32 %v845_v57, %v1150_v5  ;;  %854 = vrsqrt.f32 %v249_v55 }
  0xde   : > { %v697_v62 = vpack.c.bf16 %v275_v58, %v274_v50  ;;  %v371_v63 = vmul.f32 2.0, %v275_v58  ;;  %856 = vrsqrt.f32 %v248_v56  ;;  %v231_v0 = vpop.xlane.xlu1 %230  ;;  %v229_v1 = vpop.xlane.xlu0 %228 }
  0xdf   : > { %v847_v3 = vpop.eup %846  ;;  %v692_v4 = vpack.c.bf16 %v273_v60, %v272_v51  ;;  %v369_v6 = vmul.f32 2.0, %v273_v60  ;;  %v251_v7 = vmax.f32 %v231_v0, 1e-24  ;;  %v250_v10 = vmax.f32 %v229_v1, 1e-24 }
  0xe0   : > { %v849_v11 = vpop.eup %848  ;;  %769 = vst [vmem:[%s1223_s28 + $0x8] sm:$0xff] %v697_v62   ;;  %v737_v2 = vpack.c.bf16 %v371_v63, %v370_v59  ;;  %v277_v5 = vmul.f32 %v847_v3, %v1157_v8 }
  0xe1   : > { %693 = vst [vmem:[%s1223_s28] sm:$0xff] %v692_v4   ;;  %v732_v14 = vpack.c.bf16 %v369_v6, %v368_v61  ;;  %v276_v15 = vmul.f32 %v849_v11, %v1160_v9  ;;  %858 = vrsqrt.f32 %v251_v7 }
  0xe2   : > { %776 = vst [vmem:[%s1231_s30 + $0x8] sm:$0xff] %v737_v2   ;;  %v373_v18 = vmul.f32 2.0, %v277_v5  ;;  %860 = vrsqrt.f32 %v250_v10  ;;  %v235_v19 = vpop.xlane.xlu1 %234  ;;  %v233_v22 = vpop.xlane.xlu0 %232 }
  0xe3   : > { %v851_v23 = vpop.eup %850  ;;  %733 = vst [vmem:[%s1231_s30] sm:$0xff] %v732_v14   ;;  %v702_v8 = vpack.c.bf16 %v277_v5, %v276_v15  ;;  %v372_v26 = vmul.f32 2.0, %v276_v15  ;;  %v253_v27 = vmax.f32 %v235_v19, 1e-24  ;;  %v252_v30 = vmax.f32 %v233_v22, 1e-24 }
  0xe4   : > { %v853_v9 = vpop.eup %852  ;;  %v279_v31 = vmul.f32 %v851_v23, %v1167_v12 }
  0xe5   : > { %770 = vst [vmem:[%s1223_s28 + $0x10] sm:$0xff] %v702_v8   ;;  %v742_v32 = vpack.c.bf16 %v373_v18, %v372_v26  ;;  %v278_v33 = vmul.f32 %v853_v9, %v1170_v13  ;;  %862 = vrsqrt.f32 %v253_v27 }
  0xe6   : > { %v375_v34 = vmul.f32 2.0, %v279_v31  ;;  %864 = vrsqrt.f32 %v252_v30  ;;  %v239_v35 = vpop.xlane.xlu1 %238  ;;  %v237_v36 = vpop.xlane.xlu0 %236 }
  0xe7   : > { %v855_v37 = vpop.eup %854  ;;  %777 = vst [vmem:[%s1231_s30 + $0x10] sm:$0xff] %v742_v32   ;;  %v707_v38 = vpack.c.bf16 %v279_v31, %v278_v33  ;;  %v374_v39 = vmul.f32 2.0, %v278_v33  ;;  %v255_v40 = vmax.f32 %v239_v35, 1e-24  ;;  %v254_v41 = vmax.f32 %v237_v36, 1e-24 }
  0xe8   : > { %v857_v42 = vpop.eup %856  ;;  %v281_v12 = vmul.f32 %v855_v37, %v1177_v16 }
  0xe9   : > { %771 = vst [vmem:[%s1223_s28 + $0x18] sm:$0xff] %v707_v38   ;;  %v747_v43 = vpack.c.bf16 %v375_v34, %v374_v39  ;;  %v280_v13 = vmul.f32 %v857_v42, %v1180_v17  ;;  %866 = vrsqrt.f32 %v255_v40 }
  0xea   : > { %v377_v44 = vmul.f32 2.0, %v281_v12  ;;  %868 = vrsqrt.f32 %v254_v41 }
  0xeb   : > { %v859_v45 = vpop.eup %858  ;;  %778 = vst [vmem:[%s1231_s30 + $0x18] sm:$0xff] %v747_v43   ;;  %v712_v46 = vpack.c.bf16 %v281_v12, %v280_v13  ;;  %v376_v47 = vmul.f32 2.0, %v280_v13 }
  0xec   : > { %v861_v48 = vpop.eup %860  ;;  %v283_v49 = vmul.f32 %v859_v45, %v1187_v20 }
  0xed   : > { %772 = vst [vmem:[%s1223_s28 + $0x20] sm:$0xff] %v712_v46   ;;  %v752_v50 = vpack.c.bf16 %v377_v44, %v376_v47  ;;  %v282_v16 = vmul.f32 %v861_v48, %v1190_v21 }
  0xee   : > { %v379_v51 = vmul.f32 2.0, %v283_v49 }
  0xef   : > { %v863_v52 = vpop.eup %862  ;;  %779 = vst [vmem:[%s1231_s30 + $0x20] sm:$0xff] %v752_v50   ;;  %v717_v17 = vpack.c.bf16 %v283_v49, %v282_v16  ;;  %v378_v53 = vmul.f32 2.0, %v282_v16 }
  0xf0   : > { %v865_v54 = vpop.eup %864  ;;  %v285_v55 = vmul.f32 %v863_v52, %v1197_v24 }
  0xf1   : > { %773 = vst [vmem:[%s1223_s28 + $0x28] sm:$0xff] %v717_v17   ;;  %v757_v56 = vpack.c.bf16 %v379_v51, %v378_v53  ;;  %v284_v20 = vmul.f32 %v865_v54, %v1200_v25 }
  0xf2   : > { %v381_v57 = vmul.f32 2.0, %v285_v55 }
  0xf3   : > { %v867_v58 = vpop.eup %866  ;;  %780 = vst [vmem:[%s1231_s30 + $0x28] sm:$0xff] %v757_v56   ;;  %v722_v21 = vpack.c.bf16 %v285_v55, %v284_v20  ;;  %v380_v59 = vmul.f32 2.0, %v284_v20 }
  0xf4   : > { %v869_v60 = vpop.eup %868  ;;  %v287_v61 = vmul.f32 %v867_v58, %v1207_v28 }
  0xf5   : > { %774 = vst [vmem:[%s1223_s28 + $0x30] sm:$0xff] %v722_v21   ;;  %v762_v24 = vpack.c.bf16 %v381_v57, %v380_v59  ;;  %v286_v62 = vmul.f32 %v869_v60, %v1210_v29 }
  0xf6   : > { %v383_v63 = vmul.f32 2.0, %v287_v61 }
  0xf7   : > { %781 = vst [vmem:[%s1231_s30 + $0x30] sm:$0xff] %v762_v24   ;;  %v727_v25 = vpack.c.bf16 %v287_v61, %v286_v62  ;;  %v382_v0 = vmul.f32 2.0, %v286_v62 }
  0xf9   : > { %775 = vst [vmem:[%s1223_s28 + $0x38] sm:$0xff] %v727_v25   ;;  %v767_v28 = vpack.c.bf16 %v383_v63, %v382_v0 }
  0xfa   : > { %913 = shalt.err (!%p910_p2)
}
  0xfb   : > { %s914_s5 = scalar_lea.hbm %s1261_s16, 1024  ;;  %s918_s28 = scalar_lea.hbm %s1348_s2, 2048 }
  0xfc   : > { %p915_p4 = scmp.ne.s32.totalorder %s1261_s16, %s914_s5  ;;  %p919_p9 = scmp.lt.u32.totalorder %s1261_s16, %s1348_s2 }
  0xfd   : > { %p920_p1 = scmp.lt.u32.totalorder %s918_s28, %s914_s5  ;;  %p922_p6 = scmp.lt.u32.totalorder %s914_s5, %s1261_s16 }
  0xfe   : > { %p916_p5 = pnand %p915_p4, %p1355_p11 }
  0xff   : > { %p921_p3 = por %p920_p1, %p919_p9 }
 0x100   : > { %p917_p7 = pneg %p916_p5 }
 0x101   : > { %p923_p12 = por %p922_p6, %p921_p3 }
 0x103   : > { %p924_p13 = pnand %p923_p12, %p917_p7 }
 0x105   : > { %927 = shalt.err (!%p924_p13)
}
 0x106   : > { %s1004_s14 = smov 64   ;;  %s1005_s13 = smov 4   ;;  %782 = vst [vmem:[%s1231_s30 + $0x38] sm:$0xff] %v767_v28  }
 0x107   : > { %786 = dma.vmem_to_hbm [thread:$0]  (%p1355_p11), %s1263_s4, 1024, %s1261_s16, %s470_s23, %s1004_s14, %s1004_s14, %s1005_s13  }
 0x108   : > { %s465_s17 = scalar_lea.sflag [#allocation4], %s1126_s27  ;;  %s928_s24 = scalar_lea.vmem %s1271_s7, 1024 }
 0x109   : > { %p929_p8 = scmp.ne.s32.totalorder %s1271_s7, %s928_s24  ;;  %s1006_s25 = smov [#allocation5]  }
 0x10a   : > { %s932_s26 = sshll.u32 %s1006_s25, 4  ;;  %s933_s26 = int_to_ptr.vmem [resolvable:$false] %s932_s26 }
 0x10b   : > { %p930_p10 = pnand %p929_p8, %p1355_p11  ;;  %s934_s29 = scalar_lea.vmem %s933_s26, 2048 }
 0x10c   : > { %p935_p2 = scmp.lt.s32.totalorder %s1271_s7, %s933_s26  ;;  %p936_p4 = scmp.lt.s32.totalorder %s934_s29, %s928_s24 }
 0x10d   : > { %p931_p0 = pneg %p930_p10 }
 0x10e   : > { %p937_p5 = por %p936_p4, %p935_p2 }
 0x110   : > { %p938_p7 = pnand %p937_p5, %p931_p0 }
 0x112   : > { %941 = shalt.err (!%p938_p7)
}
 0x113   : > { %s942_s30 = scalar_lea.hbm %s1269_s19, 1024  ;;  %s946_s23 = scalar_lea.hbm %s1347_s1, 2048 }
 0x114   : > { %p943_p9 = scmp.ne.s32.totalorder %s1269_s19, %s942_s30  ;;  %p947_p6 = scmp.lt.u32.totalorder %s1269_s19, %s1347_s1 }
 0x115   : > { %p948_p12 = scmp.lt.u32.totalorder %s946_s23, %s942_s30  ;;  %p950_p8 = scmp.lt.u32.totalorder %s942_s30, %s1269_s19 }
 0x116   : > { %p944_p1 = pnand %p943_p9, %p1355_p11 }
 0x117   : > { %p949_p13 = por %p948_p12, %p947_p6 }
 0x118   : > { %p945_p3 = pneg %p944_p1 }
 0x119   : > { %p951_p10 = por %p950_p8, %p949_p13 }
 0x11b   : > { %p952_p0 = pnand %p951_p10, %p945_p3 }
 0x11d   : > { %955 = shalt.err (!%p952_p0)
}
 0x11e   : > { %785 = dma.vmem_to_hbm [thread:$0]  (%p1355_p11), %s1271_s7, 1024, %s1269_s19, %s465_s17, %s1004_s14, %s1004_s14, %s1005_s13  }
 0x11f PF: > { %s514_s20 = sand.u32 1, %s986_s9   ;;  %p1356_p2 = scmp.ne.s32.totalorder %s1353_s22, 0 }
 0x120   : > { %p1357_p4 = scmp.ge.s32.totalorder %s998_s12, 2  ;;  %s515_s28 = scalar_lea.sflag [#allocation4], %s514_s20 }
 0x122   : > { %p794_p5 = pnand %p1357_p4, %p1356_p2 }
 0x124   : > { %977 = dma.done.wait (!%p794_p5), %s515_s28, 1024  }
 0x125   : > { %979 = vsyncadd (!%p794_p5), %s515_s28, 4294966272  ;;  %s524_s21 = scalar_lea.sflag [#allocation7], %s514_s20 }
 0x126   : > { %981 = dma.done.wait (!%p794_p5), %s524_s21, 1024  }
 0x127   : > { %983 = vsyncadd (!%p794_p5), %s524_s21, 4294966272  ;;  %p19_p11 = scmp.ge.s32.totalorder %s1047_s15, 4   ;;  %s1358_s9 = smov %s990_s10 }
 0x128   : > { %s1359_s10 = smov %s994_s11  ;;  %s1360_s11 = smov %s1059_s18 }
 0x129   : > { %s1361_s12 = smov %s1047_s15  ;;  %21 = sbr.rel (!%p19_p11) target bundleno = 7 (0x7), region = 86 }
 0x130   :  { %529 = vsyncpa [#allocation3], 1 }
 0x131   :  { %531 = vsyncpa [#allocation3 + $0x1], 1 }
 0x132   :  { %532 = vsyncpa [#allocation4], 1 }
 0x133   :  { %534 = vsyncpa [#allocation4 + $0x1], 1 }
 0x134   :  { %535 = vsyncpa [#allocation7], 1 }
 0x135   :  { %537 = vsyncpa [#allocation7 + $0x1], 1 }

</bundles_post_ra>
